<compile_context>
chip_gen: v7x
topology: tpu7x:2x2x1
jax: 0.10.0
libtpu: 0.0.40
codegen_flags: <defaults>
</compile_context>

<pallas_src>
import functools
from math import sqrt

import jax
import jax.numpy as jnp
from jax import lax
from jax.experimental import pallas as pl
from jax.experimental.pallas import tpu as pltpu


def _full_attention_kernel(q_ref, k_ref, v_ref, amask_ref, kadd_ref, o_ref,
                           *, softmax_temp, num_heads, head_e, head_d):
    # q_ref: (1, TL, H*E), k_ref: (1, S, H*E), v_ref: (1, S, H*D)
    # amask_ref: (TL, S) additive attention mask (shared by all batches / heads)
    # kadd_ref:  (1, 1, S) additive key-length mask for this batch
    q = q_ref[0]                                   # (TL, H*E), native dtype
    k = k_ref[0]                                   # (S,  H*E), native dtype
    v = v_ref[0]                                   # (S,  H*D), native dtype

    # Combined additive mask for this (batch, query-tile): (TL, S), f32.
    mask = amask_ref[...] + kadd_ref[0]            # (TL, S) + (1, S) -> (TL, S)

    outs = []
    for h in range(num_heads):                     # static unrolled head loop
        qh = q[:, h * head_e:(h + 1) * head_e]     # (TL, E)
        kh = k[:, h * head_e:(h + 1) * head_e]     # (S,  E)
        vh = v[:, h * head_d:(h + 1) * head_d]     # (S,  D)

        # QK^T on the MXU with f32 accumulation; temperature applied to the f32 result.
        qk = lax.dot_general(qh, kh, (((1,), (1,)), ((), ())),
                             preferred_element_type=jnp.float32)    # (TL, S) f32
        qk = qk * softmax_temp + mask

        # Numerically-stable softmax statistics in f32.
        m = jnp.max(qk, axis=-1, keepdims=True)
        p = jnp.exp(qk - m)
        denom = jnp.sum(p, axis=-1, keepdims=True)

        # TODO(synk): attention dropout (Dropout(0.1)) is identity in eval mode; training
        # dropout would need pltpu.prng_* and is intentionally not applied here.

        # Un-normalized A @ V (probabilities cast back to the value dtype for the MXU),
        # then normalize the small (TL, D) result with the EUP approximate reciprocal.
        pv = jnp.dot(p.astype(vh.dtype), vh,
                     preferred_element_type=jnp.float32)            # (TL, D) f32
        outs.append(pv * pl.reciprocal(denom, approx=True))

    # Single lane-dense store: (TL, H*D).
    o_ref[0] = jnp.concatenate(outs, axis=-1).astype(o_ref.dtype)


def _pick_block_l(length, target=256):
    """Largest query-tile <= target that divides L and keeps (8,128) tiling legal."""
    if length <= target:
        return length
    for b in range(target, 7, -1):
        if b % 8 == 0 and length % b == 0:
            return b
    return length


def full_attention(queries, keys, values, attn_additive, key_len_additive,
                   softmax_temp=None):
    """Pallas implementation of FullAttention.forward (inference).

    queries:          (N, L, H, E)
    keys:             (N, S, H, E)
    values:           (N, S, H, D)
    attn_additive:    (L, S)   additive attention mask (0 / -inf)
    key_len_additive: (N, S)   additive key-length mask (0 / -inf)
    returns:          (N, L, H, D)
    """
    N, L, H, E = queries.shape
    _, S, _, D = values.shape
    temp = float(softmax_temp) if softmax_temp is not None else 1.0 / sqrt(E)

    # Free (contiguous) reshapes only -- no HBM transposes.
    q3 = queries.reshape(N, L, H * E)
    k3 = keys.reshape(N, S, H * E)
    v3 = values.reshape(N, S, H * D)
    kadd = key_len_additive.reshape(N, 1, S)

    block_l = _pick_block_l(L)
    grid = (N, L // block_l)

    kernel = functools.partial(_full_attention_kernel, softmax_temp=temp,
                               num_heads=H, head_e=E, head_d=D)

    out = pl.pallas_call(
        kernel,
        out_shape=jax.ShapeDtypeStruct((N, L, H * D), queries.dtype),
        grid_spec=pltpu.PrefetchScalarGridSpec(
            num_scalar_prefetch=0,
            grid=grid,
            in_specs=[
                pl.BlockSpec((1, block_l, H * E), lambda n, l: (n, l, 0)),  # q tile
                pl.BlockSpec((1, S, H * E), lambda n, l: (n, 0, 0)),        # k (all S)
                pl.BlockSpec((1, S, H * D), lambda n, l: (n, 0, 0)),        # v (all S)
                pl.BlockSpec((block_l, S), lambda n, l: (l, 0)),            # attn mask tile
                pl.BlockSpec((1, 1, S), lambda n, l: (n, 0, 0)),            # key-length mask
            ],
            out_specs=pl.BlockSpec((1, block_l, H * D), lambda n, l: (n, l, 0)),
        ),
        compiler_params=pltpu.CompilerParams(
            dimension_semantics=("parallel", "parallel")),
    )(q3, k3, v3, attn_additive, kadd)

    # Free reshape back to (N, L, H, D).
    return out.reshape(N, L, H, D)


def _reference(queries, keys, values, attn_additive, key_len_additive,
               softmax_temp=None):
    N, L, H, E = queries.shape
    temp = softmax_temp if softmax_temp is not None else 1.0 / sqrt(E)
    q = queries * temp
    qk = jnp.einsum('nlhe,nshe->nhls', q, keys)
    qk = qk + attn_additive[None, None]
    qk = qk + key_len_additive[:, None, None]
    a = jax.nn.softmax(qk, axis=-1)
    return jnp.einsum('nhls,nshd->nlhd', a, values)


if __name__ == "__main__":
    key = jax.random.PRNGKey(0)
    N, L, S, H, E, D = 2, 8, 8, 4, 32, 32

    kq, kk, kv = jax.random.split(key, 3)
    queries = jax.random.normal(kq, (N, L, H, E), dtype=jnp.float32)
    keys_ = jax.random.normal(kk, (N, S, H, E), dtype=jnp.float32)
    values = jax.random.normal(kv, (N, S, H, D), dtype=jnp.float32)

    # Deterministic masks: causal attention mask, and key lengths [S, S-2].
    causal = jnp.tril(jnp.ones((L, S), dtype=bool))
    attn_additive = jnp.where(causal, 0.0, -jnp.inf).astype(jnp.float32)

    key_lens = jnp.array([S, S - 2], dtype=jnp.int32)
    key_valid = jnp.arange(S)[None, :] < key_lens[:, None]          # (N, S)
    key_len_additive = jnp.where(key_valid, 0.0, -jnp.inf).astype(jnp.float32)

    out = full_attention(queries, keys_, values, attn_additive, key_len_additive)
    out = jax.block_until_ready(out)

    ref = _reference(queries, keys_, values, attn_additive, key_len_additive)
    assert out.shape == (N, L, H, D)
    # Tolerance accounts for the EUP approximate reciprocal in the softmax normalization.
    assert jnp.allclose(out, ref, atol=5e-3, rtol=5e-3), float(jnp.max(jnp.abs(out - ref)))

    print("KERNEL_OK")
</pallas_src>

<mosaic_0001>
module attributes {stable_mosaic.version = 11 : i64} {
  func.func @_full_attention_kernel(%arg0: i32, %arg1: i32, %arg2: memref<1x8x128xf32, #tpu.memory_space<vmem>>, %arg3: memref<1x8x128xf32, #tpu.memory_space<vmem>>, %arg4: memref<1x8x128xf32, #tpu.memory_space<vmem>>, %arg5: memref<8x8xf32, #tpu.memory_space<vmem>>, %arg6: memref<1x1x8xf32, #tpu.memory_space<vmem>>, %arg7: memref<1x8x128xf32, #tpu.memory_space<vmem>>) attributes {dimension_semantics = [#tpu.dimension_semantics<parallel>, #tpu.dimension_semantics<parallel>], iteration_bounds = array<i64: 2, 1>, scalar_prefetch = 0 : i64, scratch_operands = 0 : i64, tpu.core_type = #tpu.core_type<tc>, window_params = [{transform_indices = @transform_0, window_bounds = array<i64: 1, 8, 128>}, {transform_indices = @transform_1, window_bounds = array<i64: 1, 8, 128>}, {transform_indices = @transform_2, window_bounds = array<i64: 1, 8, 128>}, {transform_indices = @transform_3, window_bounds = array<i64: 8, 8>}, {transform_indices = @transform_4, window_bounds = array<i64: 1, 1, 8>}, {transform_indices = @transform_5, window_bounds = array<i64: 1, 8, 128>}]} {
    %c0 = arith.constant 0 : index
    %c0_0 = arith.constant 0 : index
    %c0_1 = arith.constant 0 : index
    %0 = vector.load %arg2[%c0, %c0_0, %c0_1] : memref<1x8x128xf32, #tpu.memory_space<vmem>>, vector<1x8x128xf32>
    %1 = vector.shape_cast %0 : vector<1x8x128xf32> to vector<8x128xf32>
    %c0_2 = arith.constant 0 : index
    %c0_3 = arith.constant 0 : index
    %c0_4 = arith.constant 0 : index
    %2 = vector.load %arg3[%c0_2, %c0_3, %c0_4] : memref<1x8x128xf32, #tpu.memory_space<vmem>>, vector<1x8x128xf32>
    %3 = vector.shape_cast %2 : vector<1x8x128xf32> to vector<8x128xf32>
    %c0_5 = arith.constant 0 : index
    %c0_6 = arith.constant 0 : index
    %c0_7 = arith.constant 0 : index
    %4 = vector.load %arg4[%c0_5, %c0_6, %c0_7] : memref<1x8x128xf32, #tpu.memory_space<vmem>>, vector<1x8x128xf32>
    %5 = vector.shape_cast %4 : vector<1x8x128xf32> to vector<8x128xf32>
    %c0_8 = arith.constant 0 : index
    %c0_9 = arith.constant 0 : index
    %6 = vector.load %arg5[%c0_8, %c0_9] : memref<8x8xf32, #tpu.memory_space<vmem>>, vector<8x8xf32>
    %c0_10 = arith.constant 0 : index
    %c0_11 = arith.constant 0 : index
    %c0_12 = arith.constant 0 : index
    %7 = vector.load %arg6[%c0_10, %c0_11, %c0_12] : memref<1x1x8xf32, #tpu.memory_space<vmem>>, vector<1x1x8xf32>
    %8 = vector.shape_cast %7 : vector<1x1x8xf32> to vector<1x8xf32>
    %9 = vector.broadcast %8 : vector<1x8xf32> to vector<8x8xf32>
    %10 = arith.addf %6, %9 : vector<8x8xf32>
    %11 = vector.extract_strided_slice %1 {offsets = [0, 0], sizes = [8, 32], strides = [1, 1]} : vector<8x128xf32> to vector<8x32xf32>
    %12 = vector.extract_strided_slice %3 {offsets = [0, 0], sizes = [8, 32], strides = [1, 1]} : vector<8x128xf32> to vector<8x32xf32>
    %13 = vector.extract_strided_slice %5 {offsets = [0, 0], sizes = [8, 32], strides = [1, 1]} : vector<8x128xf32> to vector<8x32xf32>
    %cst = arith.constant dense<0.000000e+00> : vector<8x8xf32>
    %14 = tpu.matmul %11, %12, %cst {dimension_numbers = #tpu.dot_dimension_numbers<[1], [1], [0], [0], [0, 0, 1, 0], [], []>} : vector<8x32xf32>, vector<8x32xf32>, vector<8x8xf32> -> vector<8x8xf32>
    %cst_13 = arith.constant 0.176776692 : f32
    %15 = vector.broadcast %cst_13 : f32 to vector<8x8xf32>
    %16 = arith.mulf %14, %15 : vector<8x8xf32>
    %17 = arith.addf %16, %10 : vector<8x8xf32>
    %cst_14 = arith.constant dense<0xFF800000> : vector<8xf32>
    %18 = vector.multi_reduction <maximumf>, %17, %cst_14 [1] : vector<8x8xf32> to vector<8xf32>
    %19 = vector.shape_cast %18 : vector<8xf32> to vector<8x1xf32>
    %20 = vector.broadcast %19 : vector<8x1xf32> to vector<8x8xf32>
    %21 = arith.subf %17, %20 : vector<8x8xf32>
    %22 = math.exp %21 : vector<8x8xf32>
    %cst_15 = arith.constant dense<0.000000e+00> : vector<8xf32>
    %23 = vector.multi_reduction <add>, %22, %cst_15 [1] : vector<8x8xf32> to vector<8xf32>
    %24 = vector.shape_cast %23 : vector<8xf32> to vector<8x1xf32>
    %cst_16 = arith.constant dense<0.000000e+00> : vector<8x32xf32>
    %25 = tpu.matmul %22, %13, %cst_16 {dimension_numbers = #tpu.dot_dimension_numbers<[1], [0], [0], [1], [0, 0, 1, 1], [], []>} : vector<8x8xf32>, vector<8x32xf32>, vector<8x32xf32> -> vector<8x32xf32>
    %26 = tpu.reciprocal %24 {approx = true} : vector<8x1xf32> -> vector<8x1xf32>
    %27 = vector.broadcast %26 : vector<8x1xf32> to vector<8x32xf32>
    %28 = arith.mulf %25, %27 : vector<8x32xf32>
    %29 = vector.extract_strided_slice %1 {offsets = [0, 32], sizes = [8, 32], strides = [1, 1]} : vector<8x128xf32> to vector<8x32xf32>
    %30 = vector.extract_strided_slice %3 {offsets = [0, 32], sizes = [8, 32], strides = [1, 1]} : vector<8x128xf32> to vector<8x32xf32>
    %31 = vector.extract_strided_slice %5 {offsets = [0, 32], sizes = [8, 32], strides = [1, 1]} : vector<8x128xf32> to vector<8x32xf32>
    %cst_17 = arith.constant dense<0.000000e+00> : vector<8x8xf32>
    %32 = tpu.matmul %29, %30, %cst_17 {dimension_numbers = #tpu.dot_dimension_numbers<[1], [1], [0], [0], [0, 0, 1, 0], [], []>} : vector<8x32xf32>, vector<8x32xf32>, vector<8x8xf32> -> vector<8x8xf32>
    %cst_18 = arith.constant 0.176776692 : f32
    %33 = vector.broadcast %cst_18 : f32 to vector<8x8xf32>
    %34 = arith.mulf %32, %33 : vector<8x8xf32>
    %35 = arith.addf %34, %10 : vector<8x8xf32>
    %cst_19 = arith.constant dense<0xFF800000> : vector<8xf32>
    %36 = vector.multi_reduction <maximumf>, %35, %cst_19 [1] : vector<8x8xf32> to vector<8xf32>
    %37 = vector.shape_cast %36 : vector<8xf32> to vector<8x1xf32>
    %38 = vector.broadcast %37 : vector<8x1xf32> to vector<8x8xf32>
    %39 = arith.subf %35, %38 : vector<8x8xf32>
    %40 = math.exp %39 : vector<8x8xf32>
    %cst_20 = arith.constant dense<0.000000e+00> : vector<8xf32>
    %41 = vector.multi_reduction <add>, %40, %cst_20 [1] : vector<8x8xf32> to vector<8xf32>
    %42 = vector.shape_cast %41 : vector<8xf32> to vector<8x1xf32>
    %cst_21 = arith.constant dense<0.000000e+00> : vector<8x32xf32>
    %43 = tpu.matmul %40, %31, %cst_21 {dimension_numbers = #tpu.dot_dimension_numbers<[1], [0], [0], [1], [0, 0, 1, 1], [], []>} : vector<8x8xf32>, vector<8x32xf32>, vector<8x32xf32> -> vector<8x32xf32>
    %44 = tpu.reciprocal %42 {approx = true} : vector<8x1xf32> -> vector<8x1xf32>
    %45 = vector.broadcast %44 : vector<8x1xf32> to vector<8x32xf32>
    %46 = arith.mulf %43, %45 : vector<8x32xf32>
    %47 = vector.extract_strided_slice %1 {offsets = [0, 64], sizes = [8, 32], strides = [1, 1]} : vector<8x128xf32> to vector<8x32xf32>
    %48 = vector.extract_strided_slice %3 {offsets = [0, 64], sizes = [8, 32], strides = [1, 1]} : vector<8x128xf32> to vector<8x32xf32>
    %49 = vector.extract_strided_slice %5 {offsets = [0, 64], sizes = [8, 32], strides = [1, 1]} : vector<8x128xf32> to vector<8x32xf32>
    %cst_22 = arith.constant dense<0.000000e+00> : vector<8x8xf32>
    %50 = tpu.matmul %47, %48, %cst_22 {dimension_numbers = #tpu.dot_dimension_numbers<[1], [1], [0], [0], [0, 0, 1, 0], [], []>} : vector<8x32xf32>, vector<8x32xf32>, vector<8x8xf32> -> vector<8x8xf32>
    %cst_23 = arith.constant 0.176776692 : f32
    %51 = vector.broadcast %cst_23 : f32 to vector<8x8xf32>
    %52 = arith.mulf %50, %51 : vector<8x8xf32>
    %53 = arith.addf %52, %10 : vector<8x8xf32>
    %cst_24 = arith.constant dense<0xFF800000> : vector<8xf32>
    %54 = vector.multi_reduction <maximumf>, %53, %cst_24 [1] : vector<8x8xf32> to vector<8xf32>
    %55 = vector.shape_cast %54 : vector<8xf32> to vector<8x1xf32>
    %56 = vector.broadcast %55 : vector<8x1xf32> to vector<8x8xf32>
    %57 = arith.subf %53, %56 : vector<8x8xf32>
    %58 = math.exp %57 : vector<8x8xf32>
    %cst_25 = arith.constant dense<0.000000e+00> : vector<8xf32>
    %59 = vector.multi_reduction <add>, %58, %cst_25 [1] : vector<8x8xf32> to vector<8xf32>
    %60 = vector.shape_cast %59 : vector<8xf32> to vector<8x1xf32>
    %cst_26 = arith.constant dense<0.000000e+00> : vector<8x32xf32>
    %61 = tpu.matmul %58, %49, %cst_26 {dimension_numbers = #tpu.dot_dimension_numbers<[1], [0], [0], [1], [0, 0, 1, 1], [], []>} : vector<8x8xf32>, vector<8x32xf32>, vector<8x32xf32> -> vector<8x32xf32>
    %62 = tpu.reciprocal %60 {approx = true} : vector<8x1xf32> -> vector<8x1xf32>
    %63 = vector.broadcast %62 : vector<8x1xf32> to vector<8x32xf32>
    %64 = arith.mulf %61, %63 : vector<8x32xf32>
    %65 = vector.extract_strided_slice %1 {offsets = [0, 96], sizes = [8, 32], strides = [1, 1]} : vector<8x128xf32> to vector<8x32xf32>
    %66 = vector.extract_strided_slice %3 {offsets = [0, 96], sizes = [8, 32], strides = [1, 1]} : vector<8x128xf32> to vector<8x32xf32>
    %67 = vector.extract_strided_slice %5 {offsets = [0, 96], sizes = [8, 32], strides = [1, 1]} : vector<8x128xf32> to vector<8x32xf32>
    %cst_27 = arith.constant dense<0.000000e+00> : vector<8x8xf32>
    %68 = tpu.matmul %65, %66, %cst_27 {dimension_numbers = #tpu.dot_dimension_numbers<[1], [1], [0], [0], [0, 0, 1, 0], [], []>} : vector<8x32xf32>, vector<8x32xf32>, vector<8x8xf32> -> vector<8x8xf32>
    %cst_28 = arith.constant 0.176776692 : f32
    %69 = vector.broadcast %cst_28 : f32 to vector<8x8xf32>
    %70 = arith.mulf %68, %69 : vector<8x8xf32>
    %71 = arith.addf %70, %10 : vector<8x8xf32>
    %cst_29 = arith.constant dense<0xFF800000> : vector<8xf32>
    %72 = vector.multi_reduction <maximumf>, %71, %cst_29 [1] : vector<8x8xf32> to vector<8xf32>
    %73 = vector.shape_cast %72 : vector<8xf32> to vector<8x1xf32>
    %74 = vector.broadcast %73 : vector<8x1xf32> to vector<8x8xf32>
    %75 = arith.subf %71, %74 : vector<8x8xf32>
    %76 = math.exp %75 : vector<8x8xf32>
    %cst_30 = arith.constant dense<0.000000e+00> : vector<8xf32>
    %77 = vector.multi_reduction <add>, %76, %cst_30 [1] : vector<8x8xf32> to vector<8xf32>
    %78 = vector.shape_cast %77 : vector<8xf32> to vector<8x1xf32>
    %cst_31 = arith.constant dense<0.000000e+00> : vector<8x32xf32>
    %79 = tpu.matmul %76, %67, %cst_31 {dimension_numbers = #tpu.dot_dimension_numbers<[1], [0], [0], [1], [0, 0, 1, 1], [], []>} : vector<8x8xf32>, vector<8x32xf32>, vector<8x32xf32> -> vector<8x32xf32>
    %80 = tpu.reciprocal %78 {approx = true} : vector<8x1xf32> -> vector<8x1xf32>
    %81 = vector.broadcast %80 : vector<8x1xf32> to vector<8x32xf32>
    %82 = arith.mulf %79, %81 : vector<8x32xf32>
    %83 = tpu.concatenate %28, %46, %64, %82 in 1 : vector<8x32xf32>, vector<8x32xf32>, vector<8x32xf32>, vector<8x32xf32> -> vector<8x128xf32>
    %c0_32 = arith.constant 0 : index
    %c0_33 = arith.constant 0 : index
    %c0_34 = arith.constant 0 : index
    %84 = vector.load %arg7[%c0_32, %c0_33, %c0_34] : memref<1x8x128xf32, #tpu.memory_space<vmem>>, vector<1x8x128xf32>
    %85 = vector.shape_cast %84 : vector<1x8x128xf32> to vector<8x128xf32>
    %86 = vector.shape_cast %83 : vector<8x128xf32> to vector<1x8x128xf32>
    tpu.vector_store %arg7[%c0_32, %c0_33, %c0_34], %86 {strides = array<i32>} : memref<1x8x128xf32, #tpu.memory_space<vmem>>, vector<1x8x128xf32>,
    return
  }
  func.func @transform_0(%arg0: i32, %arg1: i32) -> (i32, i32, i32) {
    %c0_i32 = arith.constant 0 : i32
    %c0_i32_0 = arith.constant 0 : i32
    return %arg0, %arg1, %c0_i32 : i32, i32, i32
  }
  func.func @transform_1(%arg0: i32, %arg1: i32) -> (i32, i32, i32) {
    %c0_i32 = arith.constant 0 : i32
    %c0_i32_0 = arith.constant 0 : i32
    %c0_i32_1 = arith.constant 0 : i32
    return %arg0, %c0_i32, %c0_i32_0 : i32, i32, i32
  }
  func.func @transform_2(%arg0: i32, %arg1: i32) -> (i32, i32, i32) {
    %c0_i32 = arith.constant 0 : i32
    %c0_i32_0 = arith.constant 0 : i32
    %c0_i32_1 = arith.constant 0 : i32
    return %arg0, %c0_i32, %c0_i32_0 : i32, i32, i32
  }
  func.func @transform_3(%arg0: i32, %arg1: i32) -> (i32, i32) {
    %c0_i32 = arith.constant 0 : i32
    %c0_i32_0 = arith.constant 0 : i32
    return %arg1, %c0_i32 : i32, i32
  }
  func.func @transform_4(%arg0: i32, %arg1: i32) -> (i32, i32, i32) {
    %c0_i32 = arith.constant 0 : i32
    %c0_i32_0 = arith.constant 0 : i32
    %c0_i32_1 = arith.constant 0 : i32
    return %arg0, %c0_i32, %c0_i32_0 : i32, i32, i32
  }
  func.func @transform_5(%arg0: i32, %arg1: i32) -> (i32, i32, i32) {
    %c0_i32 = arith.constant 0 : i32
    %c0_i32_0 = arith.constant 0 : i32
    return %arg0, %arg1, %c0_i32 : i32, i32, i32
  }
}

</mosaic_0001>

<bundles_post_ra>
// kernel: tpu_custom_call.1
= control target key start
LH: loop header
LB: loop body
LE: loop exit
PB: predicated region body
PF: predicated region fallthrough
CT: control target
= control target key end

     0   :  { %s1952_s0 = inlined_call_operand.hbm [shape: f32[2,8,128], index: 0, kind: input, shape index: {}]   ;;  %s1953_s1 = inlined_call_operand.hbm [shape: f32[2,8,128], index: 1, kind: input, shape index: {}]   ;;  %s1954_s2 = inlined_call_operand.hbm [shape: f32[2,8,128], index: 2, kind: input, shape index: {}]   ;;  %s1955_s3 = inlined_call_operand.vmem [shape: f32[8,8], index: 3, kind: input, shape index: {}]   ;;  %s1956_s4 = inlined_call_operand.vmem [shape: f32[2,1,8], index: 4, kind: input, shape index: {}]   ;;  %s1957_s5 = inlined_call_operand.hbm [shape: f32[2,8,128], index: 5, kind: output, shape index: {}]  }
   0x1   :  { %1967 = sst [smem:[#allocation17_spill]] %s1953_s1 }
   0x2   :  { %10 = vsyncpa [#allocation3], 0 }
   0x3   :  { %12 = vsyncpa [#allocation3 + $0x1], 0 }
   0x4   :  { %13 = vsyncpa [#allocation6], 0 }
   0x5   :  { %15 = vsyncpa [#allocation6 + $0x1], 0 }
   0x6   :  { %16 = vsyncpa [#allocation4], 0 }
   0x7   :  { %18 = vsyncpa [#allocation4 + $0x1], 0  ;;  %s1616_s18 = smov 0   ;;  %s1618_s19 = smov 0  }
   0x8   :  { %s1620_s20 = smov 0   ;;  %s1622_s21 = smov 0  }
   0x9   :  { %s1624_s22 = smov 0   ;;  %s1626_s23 = smov 0  }
   0xa LB: > { %1968 = sst [smem:[#allocation12_spill]] %s1571_s22  ;;  %s1647_s24 = sadd.s32 4294967295, %s1575_s23   ;;  %s1575_s23 = sphi %s1626_s23, %s24_s23   ;;  %s1571_s22 = sphi %s1624_s22, %s1994_s22   ;;  %s1567_s21 = sphi %s1622_s21, %s1993_s21   ;;  %s1563_s20 = sphi %s1620_s20, %s1997_s20   ;;  %s1559_s19 = sphi %s1618_s19, %s1996_s19   ;;  %s1555_s18 = sphi %s1616_s18, %s1995_s18  }
   0xb   : > { %1969 = sst [smem:[#allocation13_spill]] %s1575_s23  ;;  %s1218_s25 = sadd.s32 4294967294, %s1575_s23  }
   0xc   : > { %s36_s26 = sadd.s32 1, %s1571_s22  ;;  %s45_s27 = sadd.s32 1, %s1563_s20 }
   0xd   : > { %p38_p0 = scmp.ge.s32.totalorder %s36_s26, 2  ;;  %p52_p1 = scmp.ne.s32.totalorder %s1563_s20, %s1559_s19 }
   0xe   : > { %p53_p2 = scmp.eq.s32.totalorder %s1575_s23, 0  ;;  %p58_p3 = scmp.ne.s32.totalorder %s1559_s19, %s1555_s18 }
   0xf   : > { %s1999_s26 = smov (%p38_p0, %s36_s26), 0  ;;  %p59_p5 = scmp.eq.s32.totalorder %s1647_s24, 0 }
  0x10   : > { %1970 = sst [smem:[#allocation14_spill]] %s1999_s26  ;;  %p1659_p4 = por %p53_p2, %p52_p1 }
  0x11   : > { %s40_s29 = ssub.s32 %s1571_s22, %s1999_s26  ;;  %p188_p6 = scmp.eq.s32.totalorder %s1647_s24, 1 }
  0x12   : > { %p43_p7 = scmp.eq.s32.totalorder %s40_s29, 0  ;;  %p1667_p8 = por %p59_p5, %p58_p3 }
  0x13   : > { %p1671_p9 = por %p188_p6, %p52_p1  ;;  %p194_p10 = scmp.eq.s32.totalorder %s1218_s25, 1 }
  0x14   : > { %s1972_s30 = scalar_select %p1667_p8, 1, 0 }
  0x15   : > { %s1973_s6 = scalar_select %p1671_p9, 1, 0 }
  0x16   : > { %s1676_s7 = scalar_select %p43_p7, %s1563_s20, %s45_s27  }
  0x17   : > { %p1678_p11 = por %p194_p10, %p58_p3  ;;  %p1328_p13 = scmp.lt.s32.totalorder %s1575_s23, 2 }
  0x18   : > { %1974 = sst [smem:[#allocation15_spill]] %s1676_s7  ;;  %s1958_s9 = sand.u32 1, %s1563_s20  }
  0x19   : > { %s1975_s8 = scalar_select %p1678_p11, 1, 0 }
  0x1a   : > { %s1687_s10 = sshll.u32 %s1958_s9, 3  ;;  %s1690_s11 = sshll.u32 %s1571_s22, 7 }
  0x1b   : > { %1976 = sst [smem:[#allocation16_spill]] %s1975_s8  ;;  %p1694_p0 = pnand %p1328_p13, %p1659_p4 }
  0x1c   : > { %s240_s13 = sand.u32 1, %s1575_s23   ;;  %s1978_s1 = sld [smem:[#allocation17_spill]] }
  0x1d   : > { %s1977_s12 = scalar_select %p1694_p0, 1, 0 }
  0x1e   : > { %s244_s17 = scalar_lea.vmem [#allocation5], %s1687_s10  ;;  %s1710_s27 = scalar_lea.sflag [#allocation6], %s240_s13 }
  0x1f   : > { %s251_s25 = sshll.u32 %s244_s17, 4  ;;  %p1716_p4 = pneg %p1694_p0  ;;  %s1707_s25 = int_to_ptr.vmem [resolvable:$true] %s251_s25 }
  0x22   : > { %s1703_s16 = scalar_lea.hbm %s1978_s1, %s1690_s11  ;;  %s1404_s17 = scalar_lea.hbm %s1978_s1, 256 }
  0x23   : > { %s1399_s28 = scalar_lea.hbm %s1703_s16, 128  ;;  %p1405_p7 = scmp.lt.u32.totalorder %s1703_s16, %s1978_s1 }
  0x24   : > { %p1400_p3 = scmp.ne.s32.totalorder %s1703_s16, %s1399_s28  ;;  %p1406_p10 = scmp.lt.u32.totalorder %s1404_s17, %s1399_s28 }
  0x25   : > { %p1408_p12 = scmp.lt.u32.totalorder %s1399_s28, %s1703_s16 }
  0x26   : > { %p1402_p5 = pnand %p1716_p4, %p1400_p3  ;;  %p1407_p13 = por %p1406_p10, %p1405_p7 }
  0x28   : > { %p1403_p6 = pneg %p1402_p5  ;;  %p1409_p1 = por %p1408_p12, %p1407_p13 }
  0x2a   : > { %p1410_p2 = pnand %p1409_p1, %p1403_p6 }
  0x2c   : > { %1413 = shalt.err (!%p1410_p2)
}
  0x2d   : > { %s1414_s13 = scalar_lea.vmem %s1707_s25, 128  ;;  %s1577_s14 = smov [#allocation5]  }
  0x2e   : > { %p1415_p3 = scmp.ne.s32.totalorder %s1707_s25, %s1414_s13  ;;  %s1419_s15 = sshll.u32 %s1577_s14, 4  ;;  %s1420_s15 = int_to_ptr.vmem [resolvable:$false] %s1419_s15 }
  0x2f   : > { %s1421_s26 = scalar_lea.vmem %s1420_s15, 256  ;;  %p1422_p9 = scmp.lt.s32.totalorder %s1707_s25, %s1420_s15 }
  0x30   : > { %p1417_p5 = pnand %p1415_p3, %p1716_p4  ;;  %p1423_p8 = scmp.lt.s32.totalorder %s1421_s26, %s1414_s13 }
  0x32   : > { %p1418_p11 = pneg %p1417_p5  ;;  %p1424_p7 = por %p1423_p8, %p1422_p9 }
  0x34   : > { %p1425_p10 = pnand %p1424_p7, %p1418_p11 }
  0x36   : > { %1428 = shalt.err (!%p1425_p10)
}
  0x37   : > { %1320 = dma.hbm_to_vmem [thread:$0]  (!%p1694_p0), %s1703_s16, 128, %s1707_s25, %s1710_s27  }
  0x38   : > { %p1980_p12 = scmp.lt.s32.totalorder %s1575_s23, 3  ;;  %p1981_p1 = scmp.ge.s32.totalorder %s1575_s23, 1 }
  0x39   : > { %s1752_s13 = scalar_lea.hbm %s1952_s0, %s1690_s11  ;;  %s225_s14 = scalar_lea.vmem [#allocation2], %s1687_s10 }
  0x3a   : > { %p1744_p2 = pnand %p1981_p1, %p1980_p12  ;;  %s233_s15 = sshll.u32 %s225_s14, 4  ;;  %s1755_s15 = int_to_ptr.vmem [resolvable:$true] %s233_s15 }
  0x3b   : > { %s1761_s26 = scalar_lea.hbm %s1954_s2, %s1690_s11  ;;  %s1983_s1 = sand.u32 1, %s1563_s20  }
  0x3c   : > { %s1982_s9 = scalar_select %p1744_p2, 1, 0 }
  0x3d   : > { %s222_s22 = scalar_lea.sflag [#allocation3], %s1983_s1  ;;  %s1429_s7 = scalar_lea.hbm %s1752_s13, 128 }
  0x3e   : > { %p1430_p8 = scmp.ne.s32.totalorder %s1752_s13, %s1429_s7  ;;  %s1434_s23 = scalar_lea.hbm %s1952_s0, 256 }
  0x3f   : > { %p1435_p6 = scmp.lt.u32.totalorder %s1752_s13, %s1952_s0  ;;  %p1436_p13 = scmp.lt.u32.totalorder %s1434_s23, %s1429_s7 }
  0x40   : > { %p1432_p9 = pnand %p1430_p8, %p1716_p4  ;;  %p1438_p5 = scmp.lt.u32.totalorder %s1429_s7, %s1752_s13 }
  0x41   : > { %p1437_p3 = por %p1436_p13, %p1435_p6 }
  0x42   : > { %p1433_p11 = pneg %p1432_p9 }
  0x43   : > { %p1439_p7 = por %p1438_p5, %p1437_p3 }
  0x45   : > { %p1440_p10 = pnand %p1439_p7, %p1433_p11 }
  0x47   : > { %1443 = shalt.err (!%p1440_p10)
}
  0x48   : > { %s1444_s1 = scalar_lea.vmem %s1755_s15, 128  ;;  %s1578_s11 = smov [#allocation2]  }
  0x49   : > { %p1445_p12 = scmp.ne.s32.totalorder %s1755_s15, %s1444_s1  ;;  %s1449_s16 = sshll.u32 %s1578_s11, 4  ;;  %s1450_s16 = int_to_ptr.vmem [resolvable:$false] %s1449_s16 }
  0x4a   : > { %s1451_s8 = scalar_lea.vmem %s1450_s16, 256  ;;  %p1452_p9 = scmp.lt.s32.totalorder %s1755_s15, %s1450_s16 }
  0x4b   : > { %p1447_p1 = pnand %p1445_p12, %p1716_p4  ;;  %p1453_p2 = scmp.lt.s32.totalorder %s1451_s8, %s1444_s1 }
  0x4d   : > { %p1448_p8 = pneg %p1447_p1  ;;  %p1454_p6 = por %p1453_p2, %p1452_p9 }
  0x4f   : > { %p1455_p13 = pnand %p1454_p6, %p1448_p8 }
  0x51   : > { %1458 = shalt.err (!%p1455_p13)
}
  0x52   : > { %1317 = dma.hbm_to_vmem [thread:$0]  (!%p1694_p0), %s1752_s13, 128, %s1755_s15, %s222_s22  }
  0x53   : > { %s262_s23 = scalar_lea.vmem [#allocation7], %s1687_s10  ;;  %s1459_s25 = scalar_lea.hbm %s1761_s26, 128 }
  0x54   : > { %s269_s7 = sshll.u32 %s262_s23, 4  ;;  %p1460_p11 = scmp.ne.s32.totalorder %s1761_s26, %s1459_s25  ;;  %s270_s7 = int_to_ptr.vmem [resolvable:$true] %s269_s7 }
  0x55   : > { %s1464_s14 = scalar_lea.hbm %s1954_s2, 256  ;;  %p1465_p5 = scmp.lt.u32.totalorder %s1761_s26, %s1954_s2 }
  0x56   : > { %p1462_p2 = pnand %p1460_p11, %p1716_p4  ;;  %p1466_p7 = scmp.lt.u32.totalorder %s1464_s14, %s1459_s25 }
  0x57   : > { %p1468_p12 = scmp.lt.u32.totalorder %s1459_s25, %s1761_s26 }
  0x58   : > { %p1463_p3 = pneg %p1462_p2  ;;  %p1467_p10 = por %p1466_p7, %p1465_p5 }
  0x5a   : > { %p1469_p1 = por %p1468_p12, %p1467_p10 }
  0x5c   : > { %p1470_p8 = pnand %p1469_p1, %p1463_p3 }
  0x5e   : > { %1473 = shalt.err (!%p1470_p8)
}
  0x5f   : > { %s1474_s22 = scalar_lea.vmem %s270_s7, 128  ;;  %s1579_s10 = smov [#allocation7]  }
  0x60   : > { %p1475_p9 = scmp.ne.s32.totalorder %s270_s7, %s1474_s22  ;;  %s1479_s13 = sshll.u32 %s1579_s10, 4  ;;  %s1480_s13 = int_to_ptr.vmem [resolvable:$false] %s1479_s13 }
  0x61   : > { %s1481_s15 = scalar_lea.vmem %s1480_s13, 256  ;;  %p1482_p11 = scmp.lt.s32.totalorder %s270_s7, %s1480_s13 }
  0x62   : > { %p1477_p6 = pnand %p1475_p9, %p1716_p4  ;;  %p1483_p2 = scmp.lt.s32.totalorder %s1481_s15, %s1474_s22 }
  0x64   : > { %p1478_p13 = pneg %p1477_p6  ;;  %p1484_p0 = por %p1483_p2, %p1482_p11 }
  0x66   : > { %p1485_p5 = pnand %p1484_p0, %p1478_p13 }
  0x68   : > { %1488 = shalt.err (!%p1485_p5)
}
  0x69   : > { %p1984_p7 = scmp.ne.s32.totalorder %s1977_s12, 0  ;;  %p1985_p3 = scmp.ne.s32.totalorder %s1982_s9, 0 }
  0x6a   : > { %s1808_s29 = sand.u32 (!%p1985_p3), 1, %s1559_s19   ;;  %p1986_p0 = scmp.ne.s32.totalorder (!%p1985_p3), %s1972_s30, 0 }
  0x6b   : > { %1323 = dma.hbm_to_vmem [thread:$0]  (!%p1984_p7), %s1761_s26, 128, %s270_s7, %s1710_s27  }
  0x6c   : > { %284 = sbr.rel (%p1985_p3) target bundleno = 1274 (0x4fa), region = 40  ;;  %s1811_s16 = sshll.u32 (!%p1985_p3), %s1808_s29, 3 }
  0x6d   : > { %s287_s8 = scalar_lea.sflag (!%p1985_p3), [#allocation3], %s1808_s29  ;;  %s290_s23 = scalar_lea.vmem (!%p1985_p3), [#allocation2], %s1811_s16 }
  0x73   : > { %1542 = dma.done.wait (%p1986_p0), %s287_s8, 128  }
  0x74   : > { %1544 = vsyncadd (%p1986_p0), %s287_s8, 4294967168  ;;  %s295_s12 = sand.u32 1, %s1647_s24   ;;  %s299_s9 = scalar_lea.vmem [#allocation5], %s1811_s16 }
  0x75   : > { %s296_s27 = scalar_lea.sflag [#allocation6], %s295_s12 }
  0x76   : > { %1546 = dma.done.wait (%p1986_p0), %s296_s27, 256  }
  0x77   : > { %1548 = vsyncadd (%p1986_p0), %s296_s27, 4294967040  ;;  %v1580_v0 = vmov 0.0   ;;  %vm1581_vm0 = vmmov 0   ;;  %vm371_vm1 = vcmask 261120   ;;  %v360_v1 = vld [vmem:[%s299_s9] sm:$0xff]  ;;  %v359_v2 = vld [vmem:[%s290_s23] sm:$0xff] }
  0x78   : > { %1266 = vmatprep.subr.mxu0 %v1580_v0  ;;  %1268 = vmatprep.mubr.msk.f32.mxu0 %vm1581_vm0, %v1580_v0  ;;  %s1582_s24 = smov 96   ;;  %s1583_s30 = smov 64   ;;  %v362_v3 = vld [vmem:[%s1955_s3] sm:$0xff]  ;;  %vm450_vm2 = vcmask 64512   ;;  %vm1050_vm3 = vcmask 523264   ;;  %vm1052_vm4 = vcmask 785408  }
  0x79   : > { %1271 = vmatprep.subr.mxu1 %v1580_v0  ;;  %1273 = vmatprep.mubr.msk.f32.mxu1 %vm1581_vm0, %v1580_v0  ;;  %s1584_s26 = smov 32   ;;  %p356_p4 = scmp.lt.s32.totalorder %s1567_s21, 1 }
  0x7a   : > { %1267 = vmatpush3.xpose.msk.msra.mxu0 %vm371_vm1, %v360_v1  ;;  %535 = vrot.lane.b32.xlu1 %v359_v2, %s1582_s24  ;;  %s308_s11 = scalar_lea.vmem [#allocation7], %s1811_s16  ;;  %s1247_s22 = sshll.u32 %s1567_s21, 7 }
  0x7b   : > { %1281 = vmatprep.subr.mxu0 %v1580_v0  ;;  %s357_s7 = scalar_select %p356_p4, %s1567_s21, 1  ;;  %v361_v11 = vld [vmem:[%s308_s11] sm:$0xff] }
  0x7c   : > { %1272 = vmatpush3.msra.mxu1 %v361_v11  ;;  %s351_s10 = scalar_lea.vmem [#allocation8], %s1811_s16  ;;  %s1903_s23 = scalar_lea.hbm %s1957_s5, %s1247_s22 }
  0x7d   : > { %1269 = vmatmul.mubr.msk.f32.vlgmr.msra.gmra.mrb[0].mxu0 %vm371_vm1, %v359_v2  ;;  %s358_s17 = scalar_lea.vmem %s1956_s4, %s357_s7  ;;  %1276 = vmatprep.subr.mxu1 %v1580_v0  ;;  %s1070_s13 = sshll.u32 %s351_s10, 4  ;;  %s1905_s13 = int_to_ptr.vmem [resolvable:$true] %s1070_s13 }
  0x7e   : > { %1283 = vmatprep.mubr.msk.f32.mxu0 %vm1581_vm0, %v1580_v0  ;;  %705 = vrot.lane.b32.xlu1 %v360_v1, %s1583_s30  ;;  %v1233_v4 = vld [vmem:[%s358_s17] ss:$0 sm:$0xff]  ;;  %s1056_s21 = scalar_lea.sflag [#allocation4], %s1808_s29  ;;  %s1489_s16 = scalar_lea.vmem %s1905_s13, 128 }
  0x7f   : > { %v370_v5 = vadd.f32 %v1233_v4, %v362_v3  ;;  %p1490_p10 = scmp.ne.s32.totalorder %s1905_s13, %s1489_s16  ;;  %p1987_p12 = scmp.ne.s32.totalorder %s1973_s6, 0 }
  0x80   : > { %s1585_s12 = smov [#allocation8]  }
  0x81   : > { %p1491_p1 = pnand %p1490_p10, %p1987_p12  ;;  %s1493_s27 = sshll.u32 %s1585_s12, 4  ;;  %s1494_s27 = int_to_ptr.vmem [resolvable:$false] %s1493_s27 }
  0x82   : > { %703 = vrot.lane.b32.xlu1 %v359_v2, %s1583_s30  ;;  %s1495_s9 = scalar_lea.vmem %s1494_s27, 256  ;;  %p1496_p9 = scmp.lt.s32.totalorder %s1905_s13, %s1494_s27 }
  0x83   : > { %p1492_p8 = pneg %p1491_p1  ;;  %p1497_p6 = scmp.lt.s32.totalorder %s1495_s9, %s1489_s16 }
  0x85   : > { %p1498_p13 = por %p1497_p6, %p1496_p9 }
  0x86   : > { %872 = vrot.lane.b32.xlu1 %v360_v1, %s1584_s26 }
  0x87   : > { %p1499_p11 = pnand %p1498_p13, %p1492_p8 }
  0x8a   : > { %870 = vrot.lane.b32.xlu1 %v359_v2, %s1584_s26 }
  0xec   : > { %v536_v15 = vpop.permute.xlu1 %535 }
  0xf0   : > { %v706_v16 = vpop.permute.xlu1 %705 }
  0xf4   : > { %v704_v19 = vpop.permute.xlu1 %703 }
  0xf8   : > { %v873_v20 = vpop.permute.xlu1 %872 }
  0xfc   : > { %v871_v21 = vpop.permute.xlu1 %870 }
 0x150   : > { %v444_v6 = vpop.f32.mrb[0].mxu0 }
 0x151   : > { %v448_v7 = vmul.f32 0.17677669, %v444_v6  ;;  %v1270_v8 = vpop.f32.mrb[1].mxu0 }
 0x153   : > { %v449_v9 = vadd.f32 %v448_v7, %v370_v5 }
 0x155   : > { %v451_v10 = vsel %vm450_vm2, %v449_v9, -inf }
 0x156   : > { %452 = vmax.xlane.f32.xlu0 %v451_v10 }
 0x16c   : > { %537 = vrot.lane.b32.xlu0 %v360_v1, %s1582_s24 }
 0x1e3   : > { %v453_v12 = vpop.xlane.xlu0 %452 }
 0x1e4   : > { %v454_v13 = vsub.f32 %v449_v9, %v453_v12 }
 0x1e6   : > { %v455_v14 = vmul.f32 1.442695, %v454_v13 }
 0x1e7   : > { %v538_v17 = vpop.permute.xlu0 %537 }
 0x1e8   : > { %1383 = vpow2.f32 %v455_v14 }
 0x1f2   : > { %v1853_v18 = vpop.eup %1383 }
 0x1f3   : > { %1274 = vmatmul.mubr.msk.f32.vlgmr.msra.gmra.mrb[0].mxu1 %vm450_vm2, %v1853_v18  ;;  %v457_v57 = vsel %vm450_vm2, %v1853_v18, 0.0 }
 0x1f4   : > { %1277 = vmatpush3.xpose.msk.msra.mxu1 %vm371_vm1, %v538_v17  ;;  %1278 = vmatprep.mubr.msk.f32.mxu1 %vm1581_vm0, %v1580_v0 }
 0x1f5   : > { %1286 = vmatprep.subr.mxu1 %v1580_v0 }
 0x1f7   : > { %1279 = vmatmul.mubr.msk.f32.vlgmr.msra.gmra.mrb[2].mxu1 %vm371_vm1, %v536_v15 }
 0x1f8   : > { %1287 = vmatpush3.xpose.msk.msra.mxu1 %vm371_vm1, %v706_v16  ;;  %1288 = vmatprep.mubr.msk.f32.mxu1 %vm1581_vm0, %v1580_v0 }
 0x1f9   : > { %1296 = vmatprep.subr.mxu1 %v1580_v0 }
 0x1fb   : > { %1289 = vmatmul.mubr.msk.f32.vlgmr.msra.gmra.mrb[4].mxu1 %vm371_vm1, %v704_v19 }
 0x1fc   : > { %1297 = vmatpush3.xpose.msk.msra.mxu1 %vm371_vm1, %v873_v20  ;;  %1298 = vmatprep.mubr.msk.f32.mxu1 %vm1581_vm0, %v1580_v0 }
 0x1ff   : > { %1299 = vmatmul.mubr.msk.f32.vlgmr.msra.gmra.mrb[6].mxu1 %vm371_vm1, %v871_v21 }
 0x2c6   : > { %v1871_v22 = vpop.f32.mrb[0].mxu1 }
 0x2c7   : > { %v1275_v23 = vpop.f32.mrb[1].mxu1 }
 0x2ca   : > { %v609_v24 = vpop.f32.mrb[2].mxu1 }
 0x2cb   : > { %v613_v25 = vmul.f32 0.17677669, %v609_v24  ;;  %v1280_v26 = vpop.f32.mrb[3].mxu1 }
 0x2cd   : > { %v614_v27 = vadd.f32 %v613_v25, %v370_v5 }
 0x2ce   : > { %v777_v28 = vpop.f32.mrb[4].mxu1 }
 0x2cf   : > { %v781_v29 = vmul.f32 0.17677669, %v777_v28  ;;  %v615_v30 = vsel %vm450_vm2, %v614_v27, -inf  ;;  %v1290_v31 = vpop.f32.mrb[5].mxu1 }
 0x2d0   : > { %616 = vmax.xlane.f32.xlu1 %v615_v30 }
 0x2d1   : > { %v782_v32 = vadd.f32 %v781_v29, %v370_v5 }
 0x2d2   : > { %v944_v33 = vpop.f32.mrb[6].mxu1 }
 0x2d3   : > { %v783_v34 = vsel %vm450_vm2, %v782_v32, -inf  ;;  %v1300_v35 = vpop.f32.mrb[7].mxu1  ;;  %v948_v36 = vmul.f32 0.17677669, %v944_v33 }
 0x2d4   : > { %784 = vmax.xlane.f32.xlu0 %v783_v34 }
 0x2d5   : > { %v949_v37 = vadd.f32 %v948_v36, %v370_v5 }
 0x2d7   : > { %v950_v38 = vsel %vm450_vm2, %v949_v37, -inf }
 0x2e1   : > { %792 = vrot.lane.b32.xlu1 %v361_v11, %s1583_s30 }
 0x2ea   : > { %625 = vrot.lane.b32.xlu0 %v361_v11, %s1582_s24 }
 0x305   : > { %951 = vmax.xlane.f32.xlu1 %v950_v38 }
 0x316   : > { %959 = vrot.lane.b32.xlu1 %v361_v11, %s1584_s26 }
 0x35d   : > { %v617_v39 = vpop.xlane.xlu1 %616 }
 0x35e   : > { %v618_v40 = vsub.f32 %v614_v27, %v617_v39 }
 0x360   : > { %v619_v41 = vmul.f32 1.442695, %v618_v40 }
 0x361   : > { %v785_v42 = vpop.xlane.xlu0 %784  ;;  %v793_v47 = vpop.permute.xlu1 %792 }
 0x362   : > { %1385 = vpow2.f32 %v619_v41  ;;  %v786_v43 = vsub.f32 %v782_v32, %v785_v42 }
 0x364   : > { %v787_v44 = vmul.f32 1.442695, %v786_v43 }
 0x365   : > { %v626_v45 = vpop.permute.xlu0 %625 }
 0x366   : > { %1387 = vpow2.f32 %v787_v44  ;;  %1282 = vmatpush3.msra.mxu0 %v626_v45 }
 0x367   : > { %1291 = vmatprep.subr.mxu0 %v1580_v0 }
 0x36c   : > { %v1386_v46 = vpop.eup %1385 }
 0x36d   : > { %1284 = vmatmul.mubr.msk.f32.vlgmr.msra.gmra.mrb[2].mxu0 %vm450_vm2, %v1386_v46  ;;  %v621_v48 = vsel %vm450_vm2, %v1386_v46, 0.0 }
 0x36e   : > { %1292 = vmatpush3.msra.mxu0 %v793_v47  ;;  %622 = vadd.xlane.f32.xlu0 %v621_v48 }
 0x36f   : > { %1293 = vmatprep.mubr.msk.f32.mxu0 %vm1581_vm0, %v1580_v0  ;;  %1301 = vmatprep.subr.mxu0 %v1580_v0 }
 0x370   : > { %v1388_v49 = vpop.eup %1387 }
 0x371   : > { %1294 = vmatmul.mubr.msk.f32.vlgmr.msra.gmra.mrb[4].mxu0 %vm450_vm2, %v1388_v49  ;;  %v789_v50 = vsel %vm450_vm2, %v1388_v49, 0.0 }
 0x372   : > { %790 = vadd.xlane.f32.xlu1 %v789_v50  ;;  %1303 = vmatprep.mubr.msk.f32.mxu0 %vm1581_vm0, %v1580_v0 }
 0x392   : > { %v952_v51 = vpop.xlane.xlu1 %951 }
 0x393   : > { %v953_v52 = vsub.f32 %v949_v37, %v952_v51 }
 0x395   : > { %v954_v53 = vmul.f32 1.442695, %v953_v52 }
 0x396   : > { %v960_v54 = vpop.permute.xlu1 %959 }
 0x397   : > { %1389 = vpow2.f32 %v954_v53  ;;  %1302 = vmatpush3.msra.mxu0 %v960_v54 }
 0x3a1   : > { %v1390_v55 = vpop.eup %1389 }
 0x3a2   : > { %1304 = vmatmul.mubr.msk.f32.vlgmr.msra.gmra.mrb[6].mxu0 %vm450_vm2, %v1390_v55  ;;  %v956_v56 = vsel %vm450_vm2, %v1390_v55, 0.0 }
 0x3a3   : > { %957 = vadd.xlane.f32.xlu0 %v956_v56 }
 0x3a7   : > { %458 = vadd.xlane.f32.xlu0 %v457_v57 }
 0x3fb   : > { %v623_v58 = vpop.xlane.xlu0 %622 }
 0x3fc   : > { %1391 = vrcp.f32 %v623_v58 }
 0x3ff   : > { %v791_v59 = vpop.xlane.xlu1 %790 }
 0x400   : > { %1393 = vrcp.f32 %v791_v59 }
 0x406   : > { %v1392_v60 = vpop.eup %1391 }
 0x40a   : > { %v1394_v0 = vpop.eup %1393 }
 0x430   : > { %v958_v4 = vpop.xlane.xlu0 %957 }
 0x431   : > { %1395 = vrcp.f32 %v958_v4 }
 0x434   : > { %v459_v9 = vpop.xlane.xlu0 %458 }
 0x435   : > { %1397 = vrcp.f32 %v459_v9 }
 0x43b   : > { %v1396_v5 = vpop.eup %1395 }
 0x43f   : > { %v1398_v10 = vpop.eup %1397 }
 0x440   : > { %v697_v61 = vpop.f32.mrb[2].mxu0  ;;  %v534_v12 = vmul.f32 %v1398_v10, %v1871_v22 }
 0x441   : > { %v702_v62 = vmul.f32 %v1392_v60, %v697_v61  ;;  %v1285_v63 = vpop.f32.mrb[3].mxu0 }
 0x443   : > { %1038 = vrot.lane.b32.xlu1 %v702_v62, %s1584_s26 }
 0x444   : > { %v864_v1 = vpop.f32.mrb[4].mxu0 }
 0x445   : > { %v869_v2 = vmul.f32 %v1394_v0, %v864_v1  ;;  %v1295_v3 = vpop.f32.mrb[5].mxu0 }
 0x447   : > { %1042 = vrot.lane.b32.xlu0 %v869_v2, %s1583_s30 }
 0x475   : > { %v1031_v6 = vpop.f32.mrb[6].mxu0 }
 0x476   : > { %v1036_v7 = vmul.f32 %v1396_v5, %v1031_v6  ;;  %v1305_v8 = vpop.f32.mrb[7].mxu0 }
 0x478   : > { %1046 = vrot.lane.b32.xlu1 %v1036_v7, %s1582_s24 }
 0x4b5   : > { %v1039_v11 = vpop.permute.xlu1 %1038 }
 0x4b6   : > { %v1049_v14 = vsel %vm371_vm1, %v534_v12, %v1039_v11 }
 0x4b9   : > { %v1043_v13 = vpop.permute.xlu0 %1042 }
 0x4ba   : > { %v1051_v15 = vsel %vm1050_vm3, %v1049_v14, %v1043_v13 }
 0x4ea   : > { %v1047_v16 = vpop.permute.xlu1 %1046 }
 0x4eb   : > { %v1053_v17 = vsel %vm1052_vm4, %v1051_v15, %v1047_v16 }
 0x4ec   : > { %1054 = vst [vmem:[%s351_s10] sm:$0xff] %v1053_v17 }
 0x4ed   : > { %1502 = shalt.err (!%p1499_p11)
}
 0x4ee   : > { %s1503_s29 = scalar_lea.hbm %s1903_s23, 128  ;;  %s1507_s26 = scalar_lea.hbm %s1957_s5, 256 }
 0x4ef   : > { %p1504_p2 = scmp.ne.s32.totalorder %s1903_s23, %s1503_s29  ;;  %p1508_p3 = scmp.lt.u32.totalorder %s1903_s23, %s1957_s5 }
 0x4f0   : > { %p1509_p0 = scmp.lt.u32.totalorder %s1507_s26, %s1503_s29  ;;  %p1511_p10 = scmp.lt.u32.totalorder %s1503_s29, %s1903_s23 }
 0x4f1   : > { %p1505_p5 = pnand %p1504_p2, %p1987_p12 }
 0x4f2   : > { %p1510_p4 = por %p1509_p0, %p1508_p3 }
 0x4f3   : > { %p1506_p7 = pneg %p1505_p5 }
 0x4f4   : > { %p1512_p1 = por %p1511_p10, %p1510_p4 }
 0x4f6   : > { %p1513_p8 = pnand %p1512_p1, %p1506_p7 }
 0x4f8   : > { %1516 = shalt.err (!%p1513_p8)
}
 0x4f9   : > { %1312 = dma.vmem_to_hbm [thread:$0]  (%p1987_p12), %s1905_s13, 128, %s1903_s23, %s1056_s21  }
 0x4fa PF: > { %s1988_s28 = sld [smem:[#allocation16_spill]]  ;;  %s1989_s17 = sld [smem:[#allocation13_spill]] }
 0x4fb   : > { %s1082_s14 = sand.u32 1, %s1555_s18  }
 0x4fc   : > { %s1083_s1 = scalar_lea.sflag [#allocation4], %s1082_s14 }
 0x500   : > { %p1990_p9 = scmp.ne.s32.totalorder %s1988_s28, 0  ;;  %p1991_p6 = scmp.ge.s32.totalorder %s1989_s17, 2 }
 0x502   : > { %p1325_p13 = pnand %p1991_p6, %p1990_p9 }
 0x504   : > { %1550 = dma.done.wait (!%p1325_p13), %s1083_s1, 128  }
 0x505   : > { %1552 = vsyncadd (!%p1325_p13), %s1083_s1, 4294967168  ;;  %s24_s23 = sadd.s32 1, %s1989_s17   ;;  %s1992_s6 = sld [smem:[#allocation15_spill]] }
 0x506   : > { %p21_p11 = scmp.ge.s32.totalorder %s24_s23, 4   ;;  %s1993_s21 = sld [smem:[#allocation12_spill]] }
 0x507   : > { %s1994_s22 = sld [smem:[#allocation14_spill]]  ;;  %s1995_s18 = smov %s1559_s19 }
 0x508   : > { %s1996_s19 = smov %s1563_s20  ;;  %23 = sbr.rel (!%p21_p11) target bundleno = 10 (0xa), region = 115 }
 0x50b   : > { %s1997_s20 = smov %s1992_s6 }
 0x50f   :  { %1088 = vsyncpa [#allocation3], 1 }
 0x510   :  { %1090 = vsyncpa [#allocation3 + $0x1], 1 }
 0x511   :  { %1091 = vsyncpa [#allocation6], 1 }
 0x512   :  { %1093 = vsyncpa [#allocation6 + $0x1], 1 }
 0x513   :  { %1094 = vsyncpa [#allocation4], 1 }
 0x514   :  { %1096 = vsyncpa [#allocation4 + $0x1], 1 }

</bundles_post_ra>
